<compile_context>
chip_gen: v6e
topology: v6e:2x2x1
jax: 0.10.0
libtpu: 0.0.40
codegen_flags: <defaults>
</compile_context>

<pallas_src>
import functools
import math

import jax
import jax.numpy as jnp
from jax.experimental import pallas as pl
from jax.experimental.pallas import tpu as pltpu

_LOG10000 = math.log(10000.0)


# ----------------------------- reference table -----------------------------

def make_positional_encoding_table(d_model: int, max_len: int = 5000) -> jnp.ndarray:
    """Deterministic sinusoidal table, identical math to the PyTorch __init__."""
    position = jnp.arange(0, max_len, dtype=jnp.float32)[:, None]            # (max_len, 1)
    div_term = jnp.exp(
        jnp.arange(0, d_model, 2, dtype=jnp.float32) * (-_LOG10000 / d_model)
    )                                                                         # (ceil(d/2),)
    angles = position * div_term                                              # (max_len, d/2)
    pe = jnp.zeros((max_len, d_model), dtype=jnp.float32)
    pe = pe.at[:, 0::2].set(jnp.sin(angles))
    pe = pe.at[:, 1::2].set(jnp.cos(angles)[:, : d_model // 2])
    return pe


# ----------------------------- kernel bodies -------------------------------

def _pe_synth_kernel(x_ref, o_ref, *, scale, d_model, lane_width, row_block):
    """out = x*scale + pe, with the pe tile synthesized in-kernel (no HBM read)."""
    _, TR, L = x_ref.shape
    r0 = pl.program_id(0) * row_block
    row = r0 + jax.lax.broadcasted_iota(jnp.int32, (TR, L), 0)
    lane = jax.lax.broadcasted_iota(jnp.int32, (TR, L), 1)
    if lane_width == d_model:
        s = row                         # natural layout: one position per row
        d = lane
    else:
        flat = row * lane_width + lane  # lane-repacked layout: recover (s, d)
        s = flat // d_model
        d = flat - s * d_model
    d_even = (d - (d & 1)).astype(jnp.float32)          # 2 * (d // 2)
    angle = s.astype(jnp.float32) * jnp.exp(d_even * jnp.float32(-_LOG10000 / d_model))
    pe = jnp.where((d & 1) == 0, jnp.sin(angle), jnp.cos(angle))
    o_ref[...] = (x_ref[...].astype(jnp.float32) * scale + pe[None]).astype(o_ref.dtype)


def _pe_table_kernel(x_ref, pe_ref, o_ref, *, scale):
    """Fallback: stream a precomputed f32 pe slab; broadcast over the batch dim."""
    o_ref[...] = (
        x_ref[...].astype(jnp.float32) * scale + pe_ref[...][None]
    ).astype(o_ref.dtype)


# ----------------------------- helpers -------------------------------------

def _sublane_align(itemsize: int) -> int:
    # f32 -> 8, bf16/f16 -> 16, int8/fp8 -> 32.
    return max(8, 32 // itemsize)


def _vmem_capacity_bytes() -> int:
    """Per-core VMEM capacity; conservative 64 MiB (v7x) if the query fails."""
    try:
        info = pltpu.get_tpu_info()
        cap = int(getattr(info, "vmem_capacity_bytes", 0) or 0)
        if cap >= (32 << 20):
            return cap
    except Exception:
        pass
    return 64 << 20


def _pick_row_tile(R: int, bytes_per_row_group: int, sub: int, tile_budget: int) -> int:
    """Largest sublane-aligned row tile under the per-buffer budget, forcing >=2
    grid steps when legal so the parallel grid can shard across 2 TCs (v7x)."""
    if R <= sub:
        return R
    groups_total = pl.cdiv(R, sub)
    groups = max(1, tile_budget // max(1, bytes_per_row_group))
    groups = min(groups, pl.cdiv(groups_total, 2))
    return min(groups * sub, R)


@functools.lru_cache(maxsize=None)
def _in_kernel_pe_supported() -> bool:
    """One-time probe: does Mosaic lower the iota/int-div/exp/sin/cos mix we need?"""
    def probe(o_ref):
        r = jax.lax.broadcasted_iota(jnp.int32, (8, 128), 0)
        l = jax.lax.broadcasted_iota(jnp.int32, (8, 128), 1)
        flat = r * 128 + l
        s = flat // 32
        d = flat - s * 32
        ang = s.astype(jnp.float32) * jnp.exp(
            (d - (d & 1)).astype(jnp.float32) * jnp.float32(-0.1))
        o_ref[...] = jnp.where((d & 1) == 0, jnp.sin(ang), jnp.cos(ang))

    try:
        out = pl.pallas_call(
            probe, out_shape=jax.ShapeDtypeStruct((8, 128), jnp.float32))()
        jax.block_until_ready(out)
        return True
    except Exception:
        return False


# Fallback-path cache: hoists the per-call slice/cast/reshape of the pe table
# out of the hot path (it's a full extra HBM read+write otherwise).
_PE_OPERAND_CACHE = {}


# ------------------------------- wrapper ------------------------------------

def positional_encoding_forward(
    x: jnp.ndarray,
    d_model: int,
    *,
    pe_table: jnp.ndarray | None = None,
) -> jnp.ndarray:
    """x: (B, S, D).  Returns x * sqrt(d_model) + pe[:S] (pe broadcast over batch)."""
    B, S, D = x.shape
    assert D == d_model
    scale = float(math.sqrt(d_model))
    itemsize = jnp.dtype(x.dtype).itemsize
    sub = _sublane_align(itemsize)

    # --- lane layout: keep D as the lane dim when it is 128-aligned; otherwise
    # repack to a 128-wide slab (full (8,128) tiles, unmasked stores). ---
    if D % 128 == 0 or (S * D) % 128 != 0:
        L, R = D, S
        x3 = x
    else:
        L, R = 128, (S * D) // 128
        x3 = x.reshape(B, R, L)
    lane_pad = pl.cdiv(L, 128) * 128

    # --- generation-aware VMEM budgeting ---
    vmem_cap = _vmem_capacity_bytes()
    pipeline_budget = min(48 << 20, (vmem_cap * 3) // 4)   # total pipelined footprint
    vmem_limit = int(max(32 << 20,
                         min(vmem_cap - (8 << 20), pipeline_budget + (16 << 20))))
    tile_budget = pipeline_budget // 8                      # per buffer (x/out dbl-buffered + temps)

    bytes_per_row_group = B * sub * lane_pad * itemsize     # includes sublane/lane padding
    TR = _pick_row_tile(R, bytes_per_row_group, sub, tile_budget)
    num_r = pl.cdiv(R, TR)

    compiler_params = pltpu.CompilerParams(
        dimension_semantics=("parallel",),
        vmem_limit_bytes=vmem_limit,
    )

    if _in_kernel_pe_supported():
        out3 = pl.pallas_call(
            functools.partial(_pe_synth_kernel, scale=scale, d_model=d_model,
                              lane_width=L, row_block=TR),
            out_shape=jax.ShapeDtypeStruct((B, R, L), x.dtype),
            grid_spec=pltpu.PrefetchScalarGridSpec(
                num_scalar_prefetch=0,
                grid=(num_r,),
                in_specs=[pl.BlockSpec((B, TR, L), lambda r: (0, r, 0))],
                out_specs=pl.BlockSpec((B, TR, L), lambda r: (0, r, 0)),
            ),
            compiler_params=compiler_params,
            cost_estimate=pl.CostEstimate(
                flops=2 * B * S * D,
                transcendentals=2 * S * D,
                bytes_accessed=2 * B * S * D * itemsize),
        )(x3)
    else:
        # Fallback for toolchains that cannot lower in-kernel sin/cos.
        key = (S, D, L, R)
        pe2 = _PE_OPERAND_CACHE.get(key)
        if pe2 is None:
            tbl = pe_table if pe_table is not None else make_positional_encoding_table(D, S)
            pe2 = jnp.asarray(tbl[:S, :], jnp.float32).reshape(R, L)
            _PE_OPERAND_CACHE[key] = pe2
        out3 = pl.pallas_call(
            functools.partial(_pe_table_kernel, scale=scale),
            out_shape=jax.ShapeDtypeStruct((B, R, L), x.dtype),
            grid_spec=pltpu.PrefetchScalarGridSpec(
                num_scalar_prefetch=0,
                grid=(num_r,),
                in_specs=[pl.BlockSpec((B, TR, L), lambda r: (0, r, 0)),
                          pl.BlockSpec((TR, L), lambda r: (r, 0))],
                out_specs=pl.BlockSpec((B, TR, L), lambda r: (0, r, 0)),
            ),
            compiler_params=compiler_params,
            cost_estimate=pl.CostEstimate(
                flops=2 * B * S * D,
                transcendentals=0,
                bytes_accessed=2 * B * S * D * itemsize + S * D * 4),
        )(x3, pe2)

    return out3.reshape(B, S, D)


if __name__ == "__main__":
    MAX_LEN = 64
    key = jax.random.PRNGKey(0)

    # Case 1: module-consistent small shapes (batch=2, seq=8, hidden=32)
    # -> exercises the lane-repack (B, S*D/128, 128) path.
    B, S, D = 2, 8, 32
    x = jax.random.normal(key, (B, S, D), dtype=jnp.float32)
    pe_table = make_positional_encoding_table(D, MAX_LEN)
    out = jax.block_until_ready(positional_encoding_forward(x, D, pe_table=pe_table))
    ref = x * math.sqrt(D) + pe_table[None, :S, :]
    assert out.shape == (B, S, D)
    assert jnp.allclose(out, ref, atol=5e-5, rtol=1e-5), "mismatch vs reference (repack path)"

    # Case 2: lane-aligned hidden size -> natural (B, TR, D) path, multi-step grid.
    B2, S2, D2 = 2, 16, 128
    x2 = jax.random.normal(jax.random.PRNGKey(0), (B2, S2, D2), dtype=jnp.float32)
    pe_table2 = make_positional_encoding_table(D2, MAX_LEN)
    out2 = jax.block_until_ready(positional_encoding_forward(x2, D2, pe_table=pe_table2))
    ref2 = x2 * math.sqrt(D2) + pe_table2[None, :S2, :]
    assert out2.shape == (B2, S2, D2)
    assert jnp.allclose(out2, ref2, atol=5e-5, rtol=1e-5), "mismatch vs reference (natural path)"

    print("KERNEL_OK")
</pallas_src>

<mosaic_0001>
module attributes {stable_mosaic.version = 11 : i64} {
  func.func @_pe_table_kernel(%arg0: i32, %arg1: memref<2x2x128xf32, #tpu.memory_space<vmem>>, %arg2: memref<2x128xf32, #tpu.memory_space<vmem>>, %arg3: memref<2x2x128xf32, #tpu.memory_space<vmem>>) attributes {dimension_semantics = [#tpu.dimension_semantics<parallel>], iteration_bounds = array<i64: 1>, scalar_prefetch = 0 : i64, scratch_operands = 0 : i64, tpu.core_type = #tpu.core_type<tc>, window_params = [{transform_indices = @transform_0, window_bounds = array<i64: 2, 2, 128>}, {transform_indices = @transform_1, window_bounds = array<i64: 2, 128>}, {transform_indices = @transform_2, window_bounds = array<i64: 2, 2, 128>}]} {
    %c0 = arith.constant 0 : index
    %c0_0 = arith.constant 0 : index
    %c0_1 = arith.constant 0 : index
    %0 = vector.load %arg1[%c0, %c0_0, %c0_1] : memref<2x2x128xf32, #tpu.memory_space<vmem>>, vector<2x2x128xf32>
    %cst = arith.constant 5.65685415 : f32
    %1 = vector.broadcast %cst : f32 to vector<2x2x128xf32>
    %2 = arith.mulf %0, %1 : vector<2x2x128xf32>
    %c0_2 = arith.constant 0 : index
    %c0_3 = arith.constant 0 : index
    %3 = vector.load %arg2[%c0_2, %c0_3] : memref<2x128xf32, #tpu.memory_space<vmem>>, vector<2x128xf32>
    %4 = vector.shape_cast %3 : vector<2x128xf32> to vector<1x2x128xf32>
    %5 = vector.broadcast %4 : vector<1x2x128xf32> to vector<2x2x128xf32>
    %6 = arith.addf %2, %5 : vector<2x2x128xf32>
    %c0_4 = arith.constant 0 : index
    %c0_5 = arith.constant 0 : index
    %c0_6 = arith.constant 0 : index
    %7 = vector.load %arg3[%c0_4, %c0_5, %c0_6] : memref<2x2x128xf32, #tpu.memory_space<vmem>>, vector<2x2x128xf32>
    tpu.vector_store %arg3[%c0_4, %c0_5, %c0_6], %6 {strides = array<i32>} : memref<2x2x128xf32, #tpu.memory_space<vmem>>, vector<2x2x128xf32>,
    return
  }
  func.func @transform_0(%arg0: i32) -> (i32, i32, i32) {
    %c0_i32 = arith.constant 0 : i32
    %c0_i32_0 = arith.constant 0 : i32
    %c0_i32_1 = arith.constant 0 : i32
    return %c0_i32, %arg0, %c0_i32_0 : i32, i32, i32
  }
  func.func @transform_1(%arg0: i32) -> (i32, i32) {
    %c0_i32 = arith.constant 0 : i32
    %c0_i32_0 = arith.constant 0 : i32
    return %arg0, %c0_i32 : i32, i32
  }
  func.func @transform_2(%arg0: i32) -> (i32, i32, i32) {
    %c0_i32 = arith.constant 0 : i32
    %c0_i32_0 = arith.constant 0 : i32
    %c0_i32_1 = arith.constant 0 : i32
    return %c0_i32, %arg0, %c0_i32_0 : i32, i32, i32
  }
}

</mosaic_0001>

<bundles_post_ra>
// kernel: tpu_custom_call.1
= control target key start
LH: loop header
LB: loop body
LE: loop exit
PB: predicated region body
PF: predicated region fallthrough
CT: control target
= control target key end

     0   :  { %7 = vsyncpa [#allocation3], 0  ;;  %s171_s0 = inlined_call_operand.hbm [shape: f32[2,2,128], index: 0, kind: input, shape index: {}]   ;;  %s172_s1 = inlined_call_operand.hbm [shape: f32[2,128], index: 1, kind: input, shape index: {}]   ;;  %s173_s2 = inlined_call_operand.hbm [shape: f32[2,2,128], index: 2, kind: output, shape index: {}]  }
   0x1   :  { %8 = vsyncpa [#allocation6], 0 }
   0x2   :  { %9 = vsyncpa [#allocation4], 0  ;;  %s136_s9 = smov [#allocation2]  }
   0x3   :  { %s15_s10 = sshll.u32 %s136_s9, 4  ;;  %s16_s10 = int_to_ptr.vmem [resolvable:$true] %s15_s10 }
   0x4   :  { %s78_s11 = scalar_lea.vmem %s16_s10, 64  ;;  %p83_p1 = scmp.lt.s32.totalorder %s16_s10, %s16_s10 }
   0x5   :  { %p79_p0 = scmp.ne.s32.totalorder %s16_s10, %s78_s11  ;;  %p84_p2 = scmp.lt.s32.totalorder %s78_s11, %s78_s11 }
   0x7   :  { %p85_p3 = por %p84_p2, %p83_p1 }
   0x9   :  { %p86_p4 = pnand %p85_p3, %p79_p0 }
   0xb   :  { %89 = shalt.err (!%p86_p4)
}
   0xc   :  { %s137_s12 = smov 32   ;;  %s138_s13 = smov 2  }
   0xd   :  { %21 = dma.hbm_to_vmem [thread:$0]  %s171_s0, 64, %s16_s10, [#allocation3], %s137_s12, %s137_s12, %s138_s13  }
   0xe   :  { %s139_s16 = smov [#allocation5]  }
   0xf   :  { %s28_s17 = sshll.u32 %s139_s16, 4  ;;  %s29_s17 = int_to_ptr.vmem [resolvable:$true] %s28_s17 }
  0x10   :  { %s98_s18 = scalar_lea.vmem %s29_s17, 32  ;;  %p103_p6 = scmp.lt.s32.totalorder %s29_s17, %s29_s17 }
  0x11   :  { %p99_p5 = scmp.ne.s32.totalorder %s29_s17, %s98_s18  ;;  %p104_p7 = scmp.lt.s32.totalorder %s98_s18, %s98_s18 }
  0x13   :  { %p105_p8 = por %p104_p7, %p103_p6 }
  0x15   :  { %p106_p9 = pnand %p105_p8, %p99_p5 }
  0x17   :  { %109 = shalt.err (!%p106_p9)
}
  0x18   :  { %31 = dma.hbm_to_vmem [thread:$0]  %s172_s1, 32, %s29_s17, [#allocation6]  }
  0x19   :  { %130 = dma.done.wait [#allocation3], 64  }
  0x1a   :  { %131 = vsyncadd [#allocation3], 4294967232 }
  0x1b   :  { %132 = dma.done.wait [#allocation6], 32  }
  0x1c   :  { %133 = vsyncadd [#allocation6], 4294967264  ;;  %s140_s21 = smov [#allocation7]   ;;  %v38_v0 = vld [vmem:[#allocation2] sm:$0x3] }
  0x1d   :  { %s52_s0 = sshll.u32 %s140_s21, 4  ;;  %v42_v1 = vld [vmem:[#allocation5] sm:$0x3]  ;;  %v39_v2 = vld [vmem:[#allocation2 + $0x2] sm:$0x3]  ;;  %s53_s0 = int_to_ptr.vmem [resolvable:$true] %s52_s0 }
  0x1e   :  { %v40_v3 = vmul.f32 5.656854, %v38_v0  ;;  %v41_v4 = vmul.f32 5.656854, %v39_v2  ;;  %s110_s22 = scalar_lea.vmem %s53_s0, 64  ;;  %p115_p11 = scmp.lt.s32.totalorder %s53_s0, %s53_s0 }
  0x1f   :  { %p111_p10 = scmp.ne.s32.totalorder %s53_s0, %s110_s22  ;;  %p116_p12 = scmp.lt.s32.totalorder %s110_s22, %s110_s22 }
  0x20   :  { %v43_v5 = vadd.f32 %v42_v1, %v40_v3  ;;  %v44_v6 = vadd.f32 %v42_v1, %v41_v4 }
  0x21   :  { %p117_p13 = por %p116_p12, %p115_p11 }
  0x22   :  { %45 = vst [vmem:[#allocation7] sm:$0x3] %v43_v5  ;;  %46 = vst [vmem:[#allocation7 + $0x2] sm:$0x3] %v44_v6 }
  0x23   :  { %p118_p0 = pnand %p117_p13, %p111_p10 }
  0x25   :  { %121 = shalt.err (!%p118_p0)
}
  0x26   :  { %58 = dma.vmem_to_hbm [thread:$0]  %s53_s0, 64, %s173_s2, [#allocation4], %s137_s12, %s137_s12, %s138_s13  }
  0x27   :  { %134 = dma.done.wait [#allocation4], 64  }
  0x28   :  { %135 = vsyncadd [#allocation4], 4294967232 }
  0x29   :  { %62 = vsyncpa [#allocation3], 1 }
  0x2a   :  { %63 = vsyncpa [#allocation6], 1 }
  0x2b   :  { %64 = vsyncpa [#allocation4], 1 }

</bundles_post_ra>
